<compile_context>
chip_gen: v7x
topology: tpu7x:2x2x1
jax: 0.10.0
libtpu: 0.0.40
codegen_flags: <defaults>
</compile_context>

<pallas_src>
import functools

import jax
import jax.numpy as jnp
from jax.experimental import pallas as pl
from jax.experimental.pallas import tpu as pltpu


def _linproj_kernel(x_ref, w_ref, b_ref, o_ref):
    # x_ref: (F, tT)  input tile, time on lanes
    # w_ref: (C, F)   nn.Linear weight (as stored by PyTorch: (out, in))
    # b_ref: (C, 1)   bias column (f32)
    # o_ref: (C, tT)  output tile, time on lanes
    acc = jnp.dot(w_ref[...], x_ref[...], preferred_element_type=jnp.float32)
    o_ref[...] = (acc + b_ref[...]).astype(o_ref.dtype)


@functools.partial(jax.jit, static_argnames=("max_tile_t",))
def condition_network_forward(x, w, b, *, max_tile_t=512):
    """Forward pass of CondintionNetwork.

    x: (B, field, T)   float32, NCL layout exactly like the PyTorch module
    w: (cout, field)   nn.Linear weight
    b: (cout,)         nn.Linear bias
    returns: (B, cout, T)
    """
    B, F, T = x.shape
    C = w.shape[0]

    # Time tile: full T when small (satisfies the "block dim == full dim"
    # rule for arbitrary T), otherwise a lane-aligned (multiple-of-128) tile;
    # Pallas masks the ragged tail on writeback.
    if T <= max_tile_t:
        tT = T
    else:
        tT = max(128, (max_tile_t // 128) * 128)
    n_t = pl.cdiv(T, tT)

    b_col = b.astype(jnp.float32).reshape(C, 1)

    out = pl.pallas_call(
        _linproj_kernel,
        out_shape=jax.ShapeDtypeStruct((B, C, T), x.dtype),
        grid_spec=pltpu.PrefetchScalarGridSpec(
            num_scalar_prefetch=0,
            grid=(B, n_t),
            in_specs=[
                # (1, F, tT) block of x; batch dim squeezed out of the ref.
                pl.BlockSpec((None, F, tT), lambda bi, ti: (bi, 0, ti)),
                # Grid-invariant weight and bias (not re-DMA'd across steps).
                pl.BlockSpec((C, F), lambda bi, ti: (0, 0)),
                pl.BlockSpec((C, 1), lambda bi, ti: (0, 0)),
            ],
            out_specs=pl.BlockSpec((None, C, tT), lambda bi, ti: (bi, 0, ti)),
        ),
        compiler_params=pltpu.CompilerParams(
            dimension_semantics=("parallel", "parallel")),
    )(x, w, b_col)
    return out


def init_params(key, n_layers, field, condnet_channels, kernelsize):
    """Deterministic synthetic parameter init matching the module's shapes."""
    k_w, k_b, k_conv = jax.random.split(key, 3)
    params = {
        "linproj_w": jax.random.normal(
            k_w, (condnet_channels, field), jnp.float32) * 0.1,
        "linproj_b": jax.random.normal(
            k_b, (condnet_channels,), jnp.float32) * 0.1,
    }
    # Conv1d weights exist in the module but are dead code in forward()
    # (batch_norm_layers is empty, so the zip-loop never executes).
    # TODO(synk): conv/dropout/BatchNorm branch intentionally not executed to
    # match the reference forward semantics exactly.
    dilations = [2 ** (n // 2) for n in range(n_layers)]
    params["conv_w_unused"] = [
        jax.random.normal(
            jax.random.fold_in(k_conv, i),
            (condnet_channels, condnet_channels, kernelsize), jnp.float32) * 0.1
        for i, _ in enumerate(dilations)
    ]
    return params


if __name__ == "__main__":
    # Module hyperparameters (small, consistent with the forward pass).
    n_layers = 4
    field = 4                # input channels
    condnet_channels = 32    # output channels
    kernelsize = 3
    B, T = 2, 16

    key = jax.random.PRNGKey(0)
    k_x, k_p = jax.random.split(key)
    x = jax.random.normal(k_x, (B, field, T), jnp.float32)
    params = init_params(k_p, n_layers, field, condnet_channels, kernelsize)

    out = condition_network_forward(x, params["linproj_w"], params["linproj_b"])
    jax.block_until_ready(out)

    # Cross-check against a pure-JAX reference of the same math.
    ref = jnp.einsum("bft,cf->bct", x, params["linproj_w"]) \
        + params["linproj_b"][None, :, None]
    assert out.shape == (B, condnet_channels, T)
    assert jnp.allclose(out, ref, atol=1e-5), "mismatch vs reference"

    print("KERNEL_OK")
</pallas_src>

<mosaic_0001>
module attributes {stable_mosaic.version = 11 : i64} {
  func.func @_linproj_kernel(%arg0: i32, %arg1: i32, %arg2: memref<1x4x16xf32, #tpu.memory_space<vmem>>, %arg3: memref<32x4xf32, #tpu.memory_space<vmem>>, %arg4: memref<32x1xf32, #tpu.memory_space<vmem>>, %arg5: memref<1x32x16xf32, #tpu.memory_space<vmem>>) attributes {dimension_semantics = [#tpu.dimension_semantics<parallel>, #tpu.dimension_semantics<parallel>], iteration_bounds = array<i64: 2, 1>, scalar_prefetch = 0 : i64, scratch_operands = 0 : i64, tpu.core_type = #tpu.core_type<tc>, window_params = [{transform_indices = @transform_0, window_bounds = array<i64: 1, 4, 16>}, {pipeline_mode = #tpu.pipeline_mode<synchronous>, transform_indices = @transform_1, window_bounds = array<i64: 32, 4>}, {pipeline_mode = #tpu.pipeline_mode<synchronous>, transform_indices = @transform_2, window_bounds = array<i64: 32, 1>}, {transform_indices = @transform_3, window_bounds = array<i64: 1, 32, 16>}]} {
    %c0 = arith.constant 0 : index
    %c0_0 = arith.constant 0 : index
    %0 = vector.load %arg3[%c0, %c0_0] : memref<32x4xf32, #tpu.memory_space<vmem>>, vector<32x4xf32>
    %c0_1 = arith.constant 0 : index
    %c0_2 = arith.constant 0 : index
    %c0_3 = arith.constant 0 : index
    %1 = vector.load %arg2[%c0_1, %c0_2, %c0_3] : memref<1x4x16xf32, #tpu.memory_space<vmem>>, vector<1x4x16xf32>
    %2 = vector.shape_cast %1 : vector<1x4x16xf32> to vector<4x16xf32>
    %cst = arith.constant dense<0.000000e+00> : vector<32x16xf32>
    %3 = tpu.matmul %0, %2, %cst {dimension_numbers = #tpu.dot_dimension_numbers<[1], [0], [0], [1], [0, 0, 1, 1], [], []>} : vector<32x4xf32>, vector<4x16xf32>, vector<32x16xf32> -> vector<32x16xf32>
    %c0_4 = arith.constant 0 : index
    %c0_5 = arith.constant 0 : index
    %4 = vector.load %arg4[%c0_4, %c0_5] : memref<32x1xf32, #tpu.memory_space<vmem>>, vector<32x1xf32>
    %5 = vector.broadcast %4 : vector<32x1xf32> to vector<32x16xf32>
    %6 = arith.addf %3, %5 : vector<32x16xf32>
    %c0_6 = arith.constant 0 : index
    %c0_7 = arith.constant 0 : index
    %c0_8 = arith.constant 0 : index
    %7 = vector.load %arg5[%c0_6, %c0_7, %c0_8] : memref<1x32x16xf32, #tpu.memory_space<vmem>>, vector<1x32x16xf32>
    %8 = vector.shape_cast %7 : vector<1x32x16xf32> to vector<32x16xf32>
    %9 = vector.shape_cast %6 : vector<32x16xf32> to vector<1x32x16xf32>
    tpu.vector_store %arg5[%c0_6, %c0_7, %c0_8], %9 {strides = array<i32>} : memref<1x32x16xf32, #tpu.memory_space<vmem>>, vector<1x32x16xf32>,
    return
  }
  func.func @transform_0(%arg0: i32, %arg1: i32) -> (i32, i32, i32) {
    %c0_i32 = arith.constant 0 : i32
    %c0_i32_0 = arith.constant 0 : i32
    return %arg0, %c0_i32, %arg1 : i32, i32, i32
  }
  func.func @transform_1(%arg0: i32, %arg1: i32) -> (i32, i32) {
    %c0_i32 = arith.constant 0 : i32
    %c0_i32_0 = arith.constant 0 : i32
    %c0_i32_1 = arith.constant 0 : i32
    return %c0_i32, %c0_i32_0 : i32, i32
  }
  func.func @transform_2(%arg0: i32, %arg1: i32) -> (i32, i32) {
    %c0_i32 = arith.constant 0 : i32
    %c0_i32_0 = arith.constant 0 : i32
    %c0_i32_1 = arith.constant 0 : i32
    return %c0_i32, %c0_i32_0 : i32, i32
  }
  func.func @transform_3(%arg0: i32, %arg1: i32) -> (i32, i32, i32) {
    %c0_i32 = arith.constant 0 : i32
    %c0_i32_0 = arith.constant 0 : i32
    return %arg0, %c0_i32, %arg1 : i32, i32, i32
  }
}

</mosaic_0001>

<bundles_post_ra>
// kernel: condition_network_forward.1
= control target key start
LH: loop header
LB: loop body
LE: loop exit
PB: predicated region body
PF: predicated region fallthrough
CT: control target
= control target key end

     0   :  { %s518_s12 = smov 0   ;;  %s520_s13 = smov 0   ;;  %s579_s0 = inlined_call_operand.vmem [shape: f32[2,4,16], index: 0, kind: input, shape index: {}]   ;;  %s580_s1 = inlined_call_operand.vmem [shape: f32[32,4], index: 1, kind: input, shape index: {}]   ;;  %s581_s2 = inlined_call_operand.vmem [shape: f32[32,1], index: 2, kind: input, shape index: {}]   ;;  %s582_s3 = inlined_call_operand.vmem [shape: f32[2,32,16], index: 3, kind: output, shape index: {}]  }
   0x1   :  { %s522_s14 = smov 0  }
   0x2 LB: > { %s25_s15 = sadd.s32 1, %s491_s13  ;;  %p419_p0 = scmp.ge.s32.totalorder %s495_s14, 1  ;;  %s495_s14 = sphi %s522_s14, %s13_s14   ;;  %s491_s13 = sphi %s520_s13, %s584_s13   ;;  %s487_s12 = sphi %s518_s12, %s583_s12  }
   0x3   : > { %p27_p1 = scmp.ge.s32.totalorder %s25_s15, 2  ;;  %p155_p2 = scmp.lt.s32.totalorder %s495_s14, 3 }
   0x5   : > { %s586_s15 = smov (%p27_p1, %s25_s15), 0  ;;  %p156_p3 = pnand %p419_p0, %p155_p2 }
   0x6   : > { %p184_p4 = scmp.lt.s32.totalorder (!%p156_p3), %s487_s12, 1  ;;  %v199_v0 = vld [vmem:[%s580_s1] sm:$0xff] (!%p156_p3)  ;;  %vm228_vm0 = vcmask (!%p156_p3), 31744   ;;  %v201_v1 = vld [vmem:[%s580_s1 + $0x10] sm:$0xff] (!%p156_p3)  ;;  %v497_v4 = vmov (!%p156_p3), 0   ;;  %vm241_vm1 = vcmask (!%p156_p3), 1043456  }
   0x7   : > { %159 = sbr.rel (%p156_p3) target bundleno = 236 (0xec), region = 32  ;;  %438 = vmatprep.mubr.msk.f32.mxu0 (!%p156_p3), %vm228_vm0, %v199_v0  ;;  %441 = vmatprep.mubr.msk.f32.mxu1 (!%p156_p3), %vm228_vm0, %v201_v1  ;;  %v206_v2 = vld [vmem:[%s581_s2 + $0x10] sm:$0xff] (!%p156_p3)  ;;  %v204_v3 = vld [vmem:[%s581_s2] sm:$0xff] (!%p156_p3)  ;;  %v200_v6 = vld [vmem:[%s580_s1 + $0x8] sm:$0xff] (!%p156_p3)  ;;  %vm330_vm2 = vcmask (!%p156_p3), 130048  }
   0x8   : > { %472 = vset.pattern.permute.xlu1 (!%p156_p3), %v497_v4  ;;  %471 = vset.pattern.permute.xlu0 (!%p156_p3), %v497_v4  ;;  %v202_v7 = vld [vmem:[%s580_s1 + $0x18] sm:$0xff] (!%p156_p3)  ;;  %v205_v9 = vld [vmem:[%s581_s2 + $0x8] sm:$0xff] (!%p156_p3) }
   0x9   : > { %220 = vperm.xlu1 (!%p156_p3), %472, %v206_v2   ;;  %210 = vperm.xlu0 (!%p156_p3), %471, %v204_v3   ;;  %v207_v8 = vld [vmem:[%s581_s2 + $0x18] sm:$0xff] (!%p156_p3) }
   0xd   : > { %225 = vperm.xlu1 (!%p156_p3), %472, %v207_v8   ;;  %215 = vperm.xlu0 (!%p156_p3), %471, %v205_v9  }
   0xe   : > { %s588_s12 = smov (!%p184_p4, %s487_s12), 1 }
   0xf   : > { %s420_s24 = sshll.u32 %s588_s12, 2  ;;  %s430_s9 = sshll.u32 %s588_s12, 5 }
  0x10   : > { %s190_s27 = scalar_lea.vmem %s579_s0, %s420_s24  ;;  %s198_s16 = scalar_lea.vmem %s582_s3, %s430_s9 }
  0x11   : > { %v203_v5 = vld [vmem:[%s190_s27] sm:$0xf] }
  0x12   : > { %436 = vmatprep.subr.msk.mxu0 %vm241_vm1, %v203_v5  ;;  %444 = vmatprep.subr.msk.mxu1 %vm241_vm1, %v203_v5 }
  0x13   : > { %437 = vmatpush3.msk.msra.mxu0 %vm241_vm1, %v203_v5  ;;  %445 = vmatpush3.msk.msra.mxu1 %vm241_vm1, %v203_v5 }
  0x14   : > { %439 = vmatmul.mubr.msk.f32.vlgmr.msra.gmra.mrb[0].mxu0 %vm228_vm0, %v200_v6  ;;  %442 = vmatmul.mubr.msk.f32.vlgmr.msra.gmra.mrb[0].mxu1 %vm228_vm0, %v202_v7 }
  0x88   : > { %v221_v10 = vpop.permute.xlu1 %220  ;;  %v211_v11 = vpop.permute.xlu0 %210 }
  0x8c   : > { %v226_v12 = vpop.permute.xlu1 %225  ;;  %v216_v13 = vpop.permute.xlu0 %215 }
  0xe7   : > { %v440_v14 = vpop.f32.mrb[0].mxu0  ;;  %v443_v15 = vpop.f32.mrb[0].mxu1 }
  0xe8   : > { %v317_v16 = vadd.f32 %v440_v14, %v216_v13  ;;  %v327_v17 = vadd.f32 %v443_v15, %v226_v12  ;;  %v311_v18 = vpop.f32.mrb[1].mxu0  ;;  %v321_v19 = vpop.f32.mrb[1].mxu1 }
  0xe9   : > { %v312_v20 = vadd.f32 %v311_v18, %v211_v11  ;;  %v322_v21 = vadd.f32 %v321_v19, %v221_v10 }
  0xea   : > { %332 = vst.msk [vmem:[%s198_s16 + $0x8] sm:$0xff] %vm330_vm2, %v317_v16  ;;  %334 = vst.msk [vmem:[%s198_s16 + $0x18] sm:$0xff] %vm330_vm2, %v327_v17 }
  0xeb   : > { %331 = vst.msk [vmem:[%s198_s16] sm:$0xff] %vm330_vm2, %v312_v20  ;;  %333 = vst.msk [vmem:[%s198_s16 + $0x10] sm:$0xff] %vm330_vm2, %v322_v21 }
  0xec PF: > { %s13_s14 = sadd.s32 1, %s495_s14   ;;  %s583_s12 = smov %s491_s13 }
  0xed   : > { %p10_p5 = scmp.ge.s32.totalorder %s13_s14, 4   ;;  %s584_s13 = smov %s586_s15 }
  0xef   :  { %12 = sbr.rel (!%p10_p5) target bundleno = 2 (0x2), region = 62 }

</bundles_post_ra>
